<compile_context>
chip_gen: v7x
topology: tpu7x:2x2x1
jax: 0.10.0
libtpu: 0.0.40
codegen_flags: <defaults>
</compile_context>

<pallas_src>
import jax
import jax.numpy as jnp
from jax.experimental import pallas as pl
from jax.experimental.pallas import tpu as pltpu

LANE = 128
DEFAULT_TILE_B = 512


def mlp_kernel(x_ref, w1_ref, b1_ref, w2_ref, b2_ref, w3_ref, b3_ref, o_ref):
    # x_ref: (tb, input_size) f32 (cast to bf16 on the VPU right here so the
    # HBM stream stays a single f32 read); weights bf16; biases f32.
    # All matmuls accumulate in f32 on the MXU; bias-add / ReLU stay f32;
    # activations are re-cast to bf16 between layers so every dot stays on
    # the bf16 MXU path. Output is bf16, lane-dense (128 padded classes).
    x = x_ref[...].astype(jnp.bfloat16)
    h1 = jnp.dot(x, w1_ref[...], preferred_element_type=jnp.float32) + b1_ref[...]
    h1 = jnp.maximum(h1, 0.0).astype(jnp.bfloat16)
    h2 = jnp.dot(h1, w2_ref[...], preferred_element_type=jnp.float32) + b2_ref[...]
    h2 = jnp.maximum(h2, 0.0).astype(jnp.bfloat16)
    out = jnp.dot(h2, w3_ref[...], preferred_element_type=jnp.float32) + b3_ref[...]
    o_ref[...] = out.astype(o_ref.dtype)


def mlp_forward(x_nchw, params, *, tile_b=DEFAULT_TILE_B):
    """x_nchw: [B, C, H, W] float32. Returns logits [B, 10] float32."""
    w1, b1, w2, b2, w3, b3 = params
    B = x_nchw.shape[0]
    input_size = x_nchw.shape[1] * x_nchw.shape[2] * x_nchw.shape[3]
    num_classes = w3.shape[1]

    # nn.Flatten(); keep f32 -- the bf16 cast happens inside the kernel.
    x = x_nchw.reshape(B, input_size)

    # Batch tile selection (no padding of x):
    #  * B <= 8: single block equal to the full array (satisfies the (8,128)
    #    rule via the "equals full dim" escape hatch).
    #  * B  > 8: tile is a multiple of 8, capped at tile_b, and sized so the
    #    grid has at least 2 steps (both v7x TensorCores get work). The last
    #    block may be partial; Pallas masks the OOB rows on the output write
    #    and rows are independent, so no pad pass over x is needed.
    tile_b = max(8, (tile_b // 8) * 8)
    if B <= 8:
        tb = B
    else:
        tb_two_steps = ((pl.cdiv(B, 2) + 7) // 8) * 8
        tb = min(tile_b, tb_two_steps)
    grid_b = pl.cdiv(B, tb)

    # bf16 weights (f32 accumulation happens in-kernel); biases stay f32.
    w1b = w1.astype(jnp.bfloat16)
    w2b = w2.astype(jnp.bfloat16)

    # Lane-dense output: pad the last layer to a multiple of 128 columns.
    nc_pad = max(LANE, pl.cdiv(num_classes, LANE) * LANE)
    w3b = jnp.zeros((w3.shape[0], nc_pad), jnp.bfloat16).at[:, :num_classes].set(
        w3.astype(jnp.bfloat16))
    b3p = jnp.zeros((1, nc_pad), jnp.float32).at[:, :num_classes].set(b3)

    const2d = lambda a: pl.BlockSpec(a.shape, lambda i: (0, 0))

    weight_bytes = ((w1b.size + w2b.size + w3b.size) * 2
                    + (b1.size + b2.size + b3p.size) * 4)
    cost = pl.CostEstimate(
        flops=2 * B * (input_size * 64 + 64 * 32 + 32 * nc_pad),
        bytes_accessed=4 * B * input_size + 2 * B * nc_pad + weight_bytes,
        transcendentals=0,
    )

    # VMEM budget: double-buffered f32 x tile + double-buffered bf16 out tile
    # + resident weights. Never go below the 32 MiB scoped default; cap at
    # 64 MiB (v7x physical) so the limit is valid on every generation.
    vmem_need = 2 * tb * input_size * 4 + 2 * tb * nc_pad * 2 + 2 * weight_bytes
    vmem_limit = int(min(max(2 * vmem_need, 32 * 1024 * 1024), 64 * 1024 * 1024))

    out = pl.pallas_call(
        mlp_kernel,
        out_shape=jax.ShapeDtypeStruct((B, nc_pad), jnp.bfloat16),
        grid=(grid_b,),
        in_specs=[
            pl.BlockSpec((tb, input_size), lambda i: (i, 0)),  # x: tiled over batch
            const2d(w1b), const2d(b1),                         # weights/biases resident
            const2d(w2b), const2d(b2),
            const2d(w3b), const2d(b3p),
        ],
        out_specs=pl.BlockSpec((tb, nc_pad), lambda i: (i, 0)),
        compiler_params=pltpu.CompilerParams(
            dimension_semantics=("parallel",),
            vmem_limit_bytes=vmem_limit,
        ),
        cost_estimate=cost,
        # TODO(synk): if an xprof trace shows exposed x-DMA per step, add
        # pipeline_mode=pl.Buffered(3) on the x BlockSpec only (check v7x
        # VMEM headroom first); if input_size grows far beyond ~8K, add a
        # trailing "arbitrary" K-reduction grid axis with an f32 VMEM
        # accumulator instead of shrinking the batch tile.
    )(x, w1b, b1, w2b, b2, w3b, b3p)

    return out[:, :num_classes].astype(jnp.float32)


def init_params(key, input_size):
    """Deterministic init matching the PyTorch layer shapes.
    PyTorch Linear stores weight as [out, in]; we keep them as [in, out]
    (already transposed) for the x @ W kernel convention. Biases kept 2D
    [1, out] for clean broadcasting inside the kernel."""
    dims = [(input_size, 64), (64, 32), (32, 10)]
    params = []
    for fan_in, fan_out in dims:
        kw, kb, key = jax.random.split(key, 3)
        bound = 1.0 / jnp.sqrt(fan_in)
        w = jax.random.uniform(kw, (fan_in, fan_out), jnp.float32, -bound, bound)
        b = jax.random.uniform(kb, (1, fan_out), jnp.float32, -bound, bound)
        params.extend([w, b])
    return tuple(params)


def mlp_reference(x_nchw, params):
    """Pure-JAX reference replicating the kernel's bf16/f32 mixed-precision math."""
    w1, b1, w2, b2, w3, b3 = params
    x = x_nchw.reshape(x_nchw.shape[0], -1).astype(jnp.bfloat16)
    h1 = jnp.maximum(
        jnp.dot(x, w1.astype(jnp.bfloat16), preferred_element_type=jnp.float32) + b1, 0.0)
    h2 = jnp.maximum(
        jnp.dot(h1.astype(jnp.bfloat16), w2.astype(jnp.bfloat16),
                preferred_element_type=jnp.float32) + b2, 0.0)
    logits = jnp.dot(h2.astype(jnp.bfloat16), w3.astype(jnp.bfloat16),
                     preferred_element_type=jnp.float32) + b3
    # Kernel emits bf16 logits; mirror that rounding here.
    return logits.astype(jnp.bfloat16).astype(jnp.float32)


if __name__ == "__main__":
    key = jax.random.PRNGKey(0)
    kx, kp = jax.random.split(key)

    # Small NCHW input consistent with nn.Flatten: B=2, C=4, H=W=16 -> input_size=1024
    x = jax.random.normal(kx, (2, 4, 16, 16), dtype=jnp.float32)
    input_size = 4 * 16 * 16
    params = init_params(kp, input_size)

    out = mlp_forward(x, params)
    out = jax.block_until_ready(out)

    ref = mlp_reference(x, params)
    assert out.shape == (2, 10), out.shape
    assert jnp.allclose(out, ref, atol=1e-2, rtol=1e-2), "mismatch vs reference"

    print("KERNEL_OK")
</pallas_src>

<mosaic_0001>
module attributes {stable_mosaic.version = 11 : i64} {
  func.func @mlp_kernel(%arg0: i32, %arg1: memref<2x1024xf32, #tpu.memory_space<vmem>>, %arg2: memref<1024x64xbf16, #tpu.memory_space<vmem>>, %arg3: memref<1x64xf32, #tpu.memory_space<vmem>>, %arg4: memref<64x32xbf16, #tpu.memory_space<vmem>>, %arg5: memref<1x32xf32, #tpu.memory_space<vmem>>, %arg6: memref<32x128xbf16, #tpu.memory_space<vmem>>, %arg7: memref<1x128xf32, #tpu.memory_space<vmem>>, %arg8: memref<2x128xbf16, #tpu.memory_space<vmem>>) attributes {dimension_semantics = [#tpu.dimension_semantics<parallel>], iteration_bounds = array<i64: 1>, scalar_prefetch = 0 : i64, scratch_operands = 0 : i64, tpu.core_type = #tpu.core_type<tc>, window_params = [{transform_indices = @transform_0, window_bounds = array<i64: 2, 1024>}, {pipeline_mode = #tpu.pipeline_mode<synchronous>, transform_indices = @transform_1, window_bounds = array<i64: 1024, 64>}, {pipeline_mode = #tpu.pipeline_mode<synchronous>, transform_indices = @transform_2, window_bounds = array<i64: 1, 64>}, {pipeline_mode = #tpu.pipeline_mode<synchronous>, transform_indices = @transform_3, window_bounds = array<i64: 64, 32>}, {pipeline_mode = #tpu.pipeline_mode<synchronous>, transform_indices = @transform_4, window_bounds = array<i64: 1, 32>}, {pipeline_mode = #tpu.pipeline_mode<synchronous>, transform_indices = @transform_5, window_bounds = array<i64: 32, 128>}, {pipeline_mode = #tpu.pipeline_mode<synchronous>, transform_indices = @transform_6, window_bounds = array<i64: 1, 128>}, {transform_indices = @transform_7, window_bounds = array<i64: 2, 128>}]} {
    %c0 = arith.constant 0 : index
    %c0_0 = arith.constant 0 : index
    %0 = vector.load %arg1[%c0, %c0_0] : memref<2x1024xf32, #tpu.memory_space<vmem>>, vector<2x1024xf32>
    %1 = arith.truncf %0 : vector<2x1024xf32> to vector<2x1024xbf16>
    %c0_1 = arith.constant 0 : index
    %c0_2 = arith.constant 0 : index
    %2 = vector.load %arg2[%c0_1, %c0_2] : memref<1024x64xbf16, #tpu.memory_space<vmem>>, vector<1024x64xbf16>
    %cst = arith.constant dense<0.000000e+00> : vector<2x64xf32>
    %3 = tpu.matmul %1, %2, %cst {dimension_numbers = #tpu.dot_dimension_numbers<[1], [0], [0], [1], [0, 0, 1, 1], [], []>} : vector<2x1024xbf16>, vector<1024x64xbf16>, vector<2x64xf32> -> vector<2x64xf32>
    %c0_3 = arith.constant 0 : index
    %c0_4 = arith.constant 0 : index
    %4 = vector.load %arg3[%c0_3, %c0_4] : memref<1x64xf32, #tpu.memory_space<vmem>>, vector<1x64xf32>
    %5 = vector.broadcast %4 : vector<1x64xf32> to vector<2x64xf32>
    %6 = arith.addf %3, %5 : vector<2x64xf32>
    %cst_5 = arith.constant 0.000000e+00 : f32
    %7 = vector.broadcast %cst_5 : f32 to vector<2x64xf32>
    %8 = arith.maximumf %6, %7 : vector<2x64xf32>
    %9 = arith.truncf %8 : vector<2x64xf32> to vector<2x64xbf16>
    %c0_6 = arith.constant 0 : index
    %c0_7 = arith.constant 0 : index
    %10 = vector.load %arg4[%c0_6, %c0_7] : memref<64x32xbf16, #tpu.memory_space<vmem>>, vector<64x32xbf16>
    %cst_8 = arith.constant dense<0.000000e+00> : vector<2x32xf32>
    %11 = tpu.matmul %9, %10, %cst_8 {dimension_numbers = #tpu.dot_dimension_numbers<[1], [0], [0], [1], [0, 0, 1, 1], [], []>} : vector<2x64xbf16>, vector<64x32xbf16>, vector<2x32xf32> -> vector<2x32xf32>
    %c0_9 = arith.constant 0 : index
    %c0_10 = arith.constant 0 : index
    %12 = vector.load %arg5[%c0_9, %c0_10] : memref<1x32xf32, #tpu.memory_space<vmem>>, vector<1x32xf32>
    %13 = vector.broadcast %12 : vector<1x32xf32> to vector<2x32xf32>
    %14 = arith.addf %11, %13 : vector<2x32xf32>
    %cst_11 = arith.constant 0.000000e+00 : f32
    %15 = vector.broadcast %cst_11 : f32 to vector<2x32xf32>
    %16 = arith.maximumf %14, %15 : vector<2x32xf32>
    %17 = arith.truncf %16 : vector<2x32xf32> to vector<2x32xbf16>
    %c0_12 = arith.constant 0 : index
    %c0_13 = arith.constant 0 : index
    %18 = vector.load %arg6[%c0_12, %c0_13] : memref<32x128xbf16, #tpu.memory_space<vmem>>, vector<32x128xbf16>
    %cst_14 = arith.constant dense<0.000000e+00> : vector<2x128xf32>
    %19 = tpu.matmul %17, %18, %cst_14 {dimension_numbers = #tpu.dot_dimension_numbers<[1], [0], [0], [1], [0, 0, 1, 1], [], []>} : vector<2x32xbf16>, vector<32x128xbf16>, vector<2x128xf32> -> vector<2x128xf32>
    %c0_15 = arith.constant 0 : index
    %c0_16 = arith.constant 0 : index
    %20 = vector.load %arg7[%c0_15, %c0_16] : memref<1x128xf32, #tpu.memory_space<vmem>>, vector<1x128xf32>
    %21 = vector.broadcast %20 : vector<1x128xf32> to vector<2x128xf32>
    %22 = arith.addf %19, %21 : vector<2x128xf32>
    %23 = arith.truncf %22 : vector<2x128xf32> to vector<2x128xbf16>
    %c0_17 = arith.constant 0 : index
    %c0_18 = arith.constant 0 : index
    %24 = vector.load %arg8[%c0_17, %c0_18] : memref<2x128xbf16, #tpu.memory_space<vmem>>, vector<2x128xbf16>
    tpu.vector_store %arg8[%c0_17, %c0_18], %23 {strides = array<i32>} : memref<2x128xbf16, #tpu.memory_space<vmem>>, vector<2x128xbf16>,
    return
  }
  func.func @transform_0(%arg0: i32) -> (i32, i32) {
    %c0_i32 = arith.constant 0 : i32
    %c0_i32_0 = arith.constant 0 : i32
    return %arg0, %c0_i32 : i32, i32
  }
  func.func @transform_1(%arg0: i32) -> (i32, i32) {
    %c0_i32 = arith.constant 0 : i32
    %c0_i32_0 = arith.constant 0 : i32
    %c0_i32_1 = arith.constant 0 : i32
    return %c0_i32, %c0_i32_0 : i32, i32
  }
  func.func @transform_2(%arg0: i32) -> (i32, i32) {
    %c0_i32 = arith.constant 0 : i32
    %c0_i32_0 = arith.constant 0 : i32
    %c0_i32_1 = arith.constant 0 : i32
    return %c0_i32, %c0_i32_0 : i32, i32
  }
  func.func @transform_3(%arg0: i32) -> (i32, i32) {
    %c0_i32 = arith.constant 0 : i32
    %c0_i32_0 = arith.constant 0 : i32
    %c0_i32_1 = arith.constant 0 : i32
    return %c0_i32, %c0_i32_0 : i32, i32
  }
  func.func @transform_4(%arg0: i32) -> (i32, i32) {
    %c0_i32 = arith.constant 0 : i32
    %c0_i32_0 = arith.constant 0 : i32
    %c0_i32_1 = arith.constant 0 : i32
    return %c0_i32, %c0_i32_0 : i32, i32
  }
  func.func @transform_5(%arg0: i32) -> (i32, i32) {
    %c0_i32 = arith.constant 0 : i32
    %c0_i32_0 = arith.constant 0 : i32
    %c0_i32_1 = arith.constant 0 : i32
    return %c0_i32, %c0_i32_0 : i32, i32
  }
  func.func @transform_6(%arg0: i32) -> (i32, i32) {
    %c0_i32 = arith.constant 0 : i32
    %c0_i32_0 = arith.constant 0 : i32
    %c0_i32_1 = arith.constant 0 : i32
    return %c0_i32, %c0_i32_0 : i32, i32
  }
  func.func @transform_7(%arg0: i32) -> (i32, i32) {
    %c0_i32 = arith.constant 0 : i32
    %c0_i32_0 = arith.constant 0 : i32
    return %arg0, %c0_i32 : i32, i32
  }
}

</mosaic_0001>

<bundles_post_ra>
// kernel: tpu_custom_call.1
= control target key start
LH: loop header
LB: loop body
LE: loop exit
PB: predicated region body
PF: predicated region fallthrough
CT: control target
= control target key end

     0   :  { %v36_v28 = vlaneseq  ;;  %v1222_v36 = vmov 1983009808   ;;  %s1509_s0 = inlined_call_operand.vmem [shape: f32[2,1024], index: 0, kind: input, shape index: {}]   ;;  %s1510_s1 = inlined_call_operand.vmem [shape: bf16[1024,64], index: 1, kind: input, shape index: {}]   ;;  %s1511_s2 = inlined_call_operand.vmem [shape: f32[1,64], index: 2, kind: input, shape index: {}]   ;;  %s1512_s3 = inlined_call_operand.vmem [shape: bf16[64,32], index: 3, kind: input, shape index: {}]   ;;  %s1513_s4 = inlined_call_operand.vmem [shape: f32[1,32], index: 4, kind: input, shape index: {}]   ;;  %s1514_s5 = inlined_call_operand.vmem [shape: bf16[32,128], index: 5, kind: input, shape index: {}]   ;;  %s1515_s6 = inlined_call_operand.vmem [shape: f32[1,128], index: 6, kind: input, shape index: {}]   ;;  %s1516_s7 = inlined_call_operand.hbm [shape: bf16[2,128], index: 7, kind: output, shape index: {}]  }
   0x1   :  { %v1126_v0 = vld [vmem:[%s1510_s1 + $0x40] sm:$0xff]   ;;  %v1130_v4 = vld [vmem:[%s1510_s1 + $0x48] sm:$0xff]   ;;  %v1134_v8 = vld [vmem:[%s1510_s1 + $0x50] sm:$0xff]   ;;  %v34_v37 = vunpack.c.l.s4 %v1222_v36 }
   0x2   :  { %v1127_v1 = vld [vmem:[%s1510_s1 + $0xc0] sm:$0xff]   ;;  %1006 = vmatprep.subr.bf16.mxu0 %v1126_v0  ;;  %v1131_v5 = vld [vmem:[%s1510_s1 + $0xc8] sm:$0xff]   ;;  %v1135_v9 = vld [vmem:[%s1510_s1 + $0xd0] sm:$0xff]   ;;  %v37_v33 = vshrl.u32 %v36_v28, 7 }
   0x3   :  { %v1128_v2 = vld [vmem:[%s1510_s1] sm:$0xff]   ;;  %1028 = vmatprep.subr.bf16.mxu1 %v1127_v1  ;;  %v1132_v6 = vld [vmem:[%s1510_s1 + $0x8] sm:$0xff]   ;;  %v1136_v10 = vld [vmem:[%s1510_s1 + $0x10] sm:$0xff]   ;;  %v35_v39 = vunpack.c.0.s8 %v34_v37 }
   0x4   :  { %v1129_v3 = vld [vmem:[%s1510_s1 + $0x80] sm:$0xff]   ;;  %1007 = vmatpush3.bf16.msra.mxu0 %v1128_v2  ;;  %v1133_v7 = vld [vmem:[%s1510_s1 + $0x88] sm:$0xff]   ;;  %v1137_v11 = vld [vmem:[%s1510_s1 + $0x90] sm:$0xff]  }
   0x5   :  { %1029 = vmatpush3.bf16.msra.mxu1 %v1129_v3  ;;  %1008 = vmatprep.subr.bf16.mxu0 %v1130_v4  ;;  %v1138_v12 = vld [vmem:[%s1510_s1 + $0x58] sm:$0xff]   ;;  %v1142_v16 = vld [vmem:[%s1510_s1 + $0x60] sm:$0xff]   ;;  %v1146_v20 = vld [vmem:[%s1510_s1 + $0x68] sm:$0xff]   ;;  %v1371_v41 = vsub.s32 %v35_v39, %v37_v33 }
   0x6   :  { %1030 = vmatprep.subr.bf16.mxu1 %v1131_v5  ;;  %v1139_v13 = vld [vmem:[%s1510_s1 + $0xd8] sm:$0xff]   ;;  %v1143_v17 = vld [vmem:[%s1510_s1 + $0xe0] sm:$0xff]   ;;  %v1147_v21 = vld [vmem:[%s1510_s1 + $0xe8] sm:$0xff]  }
   0x7   :  { %v1140_v14 = vld [vmem:[%s1510_s1 + $0x18] sm:$0xff]   ;;  %v1144_v18 = vld [vmem:[%s1510_s1 + $0x20] sm:$0xff]   ;;  %v1148_v22 = vld [vmem:[%s1510_s1 + $0x28] sm:$0xff]  }
   0x8   :  { %1009 = vmatpush3.bf16.msra.mxu0 %v1132_v6  ;;  %v1141_v15 = vld [vmem:[%s1510_s1 + $0x98] sm:$0xff]   ;;  %v1145_v19 = vld [vmem:[%s1510_s1 + $0xa0] sm:$0xff]   ;;  %v1149_v23 = vld [vmem:[%s1510_s1 + $0xa8] sm:$0xff]  }
   0x9   :  { %1031 = vmatpush3.bf16.msra.mxu1 %v1133_v7  ;;  %1010 = vmatprep.subr.bf16.mxu0 %v1134_v8  ;;  %v1150_v24 = vld [vmem:[%s1510_s1 + $0x70] sm:$0xff]   ;;  %v1154_v29 = vld [vmem:[%s1510_s1 + $0x78] sm:$0xff]   ;;  %v28_v34 = vld [vmem:[%s1509_s0] sm:$0xff] }
   0xa   :  { %1032 = vmatprep.subr.bf16.mxu1 %v1135_v9  ;;  %v1151_v25 = vld [vmem:[%s1510_s1 + $0xf0] sm:$0xff]   ;;  %v1155_v30 = vld [vmem:[%s1510_s1 + $0xf8] sm:$0xff]   ;;  %v1159_v35 = vld [vmem:[%s1510_s1 + $0x140] sm:$0xff]   ;;  %v32_v40 = vcombine.high %v28_v34, %v28_v34  ;;  %v39_v42 = vrot.slane %v28_v34, %v1371_v41 }
   0xb   :  { %v1152_v26 = vld [vmem:[%s1510_s1 + $0x30] sm:$0xff]   ;;  %v1156_v31 = vld [vmem:[%s1510_s1 + $0x38] sm:$0xff]   ;;  %v1160_v38 = vld [vmem:[%s1510_s1 + $0x1c0] sm:$0xff]  }
   0xc   :  { %1011 = vmatpush3.bf16.msra.mxu0 %v1136_v10  ;;  %v1153_v27 = vld [vmem:[%s1510_s1 + $0xb0] sm:$0xff]   ;;  %v1157_v32 = vld [vmem:[%s1510_s1 + $0xb8] sm:$0xff]   ;;  %v46_v43 = vrot.slane %v32_v40, %v1371_v41  ;;  %v47_v44 = vcombine.high %v39_v42, %v39_v42  ;;  %v1161_v46 = vld [vmem:[%s1510_s1 + $0x100] sm:$0xff]   ;;  %v74_v47 = vpack.c.bf16 %v39_v42, %v39_v42 }
   0xd   :  { %1033 = vmatpush3.bf16.msra.mxu1 %v1137_v11  ;;  %1012 = vmatprep.subr.bf16.mxu0 %v1138_v12  ;;  %v1162_v49 = vld [vmem:[%s1510_s1 + $0x180] sm:$0xff]   ;;  %v1163_v52 = vld [vmem:[%s1510_s1 + $0x148] sm:$0xff]   ;;  %v1167_v56 = vld [vmem:[%s1510_s1 + $0x150] sm:$0xff]  }
   0xe   :  { %1034 = vmatprep.subr.bf16.mxu1 %v1139_v13  ;;  %v48_v45 = vcombine.high %v46_v43, %v46_v43  ;;  %v76_v48 = vpack.c.bf16 %v46_v43, %v46_v43  ;;  %v75_v50 = vpack.c.bf16 %v47_v44, %v47_v44  ;;  %v1164_v53 = vld [vmem:[%s1510_s1 + $0x1c8] sm:$0xff]   ;;  %v1168_v57 = vld [vmem:[%s1510_s1 + $0x1d0] sm:$0xff]   ;;  %v1171_v60 = vld [vmem:[%s1510_s1 + $0x158] sm:$0xff]  }
   0xf   :  { %v1165_v54 = vld [vmem:[%s1510_s1 + $0x108] sm:$0xff]   ;;  %v1169_v58 = vld [vmem:[%s1510_s1 + $0x110] sm:$0xff]   ;;  %v1172_v61 = vld [vmem:[%s1510_s1 + $0x1d8] sm:$0xff]  }
  0x10   :  { %1013 = vmatpush3.bf16.msra.mxu0 %v1140_v14  ;;  %v77_v51 = vpack.c.bf16 %v48_v45, %v48_v45  ;;  %633 = vmatprep.mubr.bf16.mxu0 %v75_v50  ;;  %v1166_v55 = vld [vmem:[%s1510_s1 + $0x188] sm:$0xff]   ;;  %v1170_v59 = vld [vmem:[%s1510_s1 + $0x190] sm:$0xff]   ;;  %v1173_v62 = vld [vmem:[%s1510_s1 + $0x118] sm:$0xff]  }
  0x11   :  { %1035 = vmatpush3.bf16.msra.mxu1 %v1141_v15  ;;  %1014 = vmatprep.subr.bf16.mxu0 %v1142_v16  ;;  %v1174_v63 = vld [vmem:[%s1510_s1 + $0x198] sm:$0xff]   ;;  %v1175_v0 = vld [vmem:[%s1510_s1 + $0x160] sm:$0xff]   ;;  %v1179_v4 = vld [vmem:[%s1510_s1 + $0x168] sm:$0xff]  }
  0x12   :  { %1036 = vmatprep.subr.bf16.mxu1 %v1143_v17  ;;  %673 = vmatprep.mubr.bf16.mxu1 %v77_v51  ;;  %v1176_v1 = vld [vmem:[%s1510_s1 + $0x1e0] sm:$0xff]   ;;  %v1180_v5 = vld [vmem:[%s1510_s1 + $0x1e8] sm:$0xff]   ;;  %v1183_v8 = vld [vmem:[%s1510_s1 + $0x170] sm:$0xff]  }
  0x13   :  { %v1177_v2 = vld [vmem:[%s1510_s1 + $0x120] sm:$0xff]   ;;  %v1181_v6 = vld [vmem:[%s1510_s1 + $0x128] sm:$0xff]   ;;  %v1184_v9 = vld [vmem:[%s1510_s1 + $0x1f0] sm:$0xff]  }
  0x14   :  { %1015 = vmatpush3.bf16.msra.mxu0 %v1144_v18  ;;  %v1178_v3 = vld [vmem:[%s1510_s1 + $0x1a0] sm:$0xff]   ;;  %v1182_v7 = vld [vmem:[%s1510_s1 + $0x1a8] sm:$0xff]   ;;  %v1185_v11 = vld [vmem:[%s1510_s1 + $0x130] sm:$0xff]  }
  0x15   :  { %1037 = vmatpush3.bf16.msra.mxu1 %v1145_v19  ;;  %1016 = vmatprep.subr.bf16.mxu0 %v1146_v20  ;;  %v29_v10 = vld [vmem:[%s1509_s0 + $0x8] sm:$0xff]  ;;  %v1186_v12 = vld [vmem:[%s1510_s1 + $0x1b0] sm:$0xff]   ;;  %v1187_v15 = vld [vmem:[%s1510_s1 + $0x178] sm:$0xff]  }
  0x16   :  { %1038 = vmatprep.subr.bf16.mxu1 %v1147_v21  ;;  %v56_v13 = vrot.slane %v29_v10, %v1371_v41  ;;  %v49_v14 = vcombine.high %v29_v10, %v29_v10  ;;  %v1188_v16 = vld [vmem:[%s1510_s1 + $0x1f8] sm:$0xff]  }
  0x18   :  { %1017 = vmatpush3.bf16.msra.mxu0 %v1148_v22  ;;  %v64_v17 = vcombine.high %v56_v13, %v56_v13  ;;  %v63_v18 = vrot.slane %v49_v14, %v1371_v41 }
  0x19   :  { %1039 = vmatpush3.bf16.msra.mxu1 %v1149_v23  ;;  %1018 = vmatprep.subr.bf16.mxu0 %v1150_v24 }
  0x1a   :  { %1040 = vmatprep.subr.bf16.mxu1 %v1151_v25 }
  0x1c   :  { %1019 = vmatpush3.bf16.msra.mxu0 %v1152_v26 }
  0x1d   :  { %1041 = vmatpush3.bf16.msra.mxu1 %v1153_v27  ;;  %1020 = vmatprep.subr.bf16.mxu0 %v1154_v29 }
  0x1e   :  { %1042 = vmatprep.subr.bf16.mxu1 %v1155_v30 }
  0x20   :  { %1021 = vmatpush3.bf16.msra.mxu0 %v1156_v31 }
  0x21   :  { %1043 = vmatpush3.bf16.msra.mxu1 %v1157_v32  ;;  %1050 = vmatprep.subr.bf16.mxu0 %v1159_v35 }
  0x22   :  { %1072 = vmatprep.subr.bf16.mxu1 %v1160_v38 }
  0x23   :  { %634 = vmatmul.mubr.bf16.vlgmr.msra.gmra.mrb[0].mxu0 %v74_v47 }
  0x24   :  { %674 = vmatmul.mubr.bf16.vlgmr.msra.gmra.mrb[0].mxu1 %v76_v48  ;;  %1051 = vmatpush3.bf16.msra.mxu0 %v1161_v46 }
  0x25   :  { %1073 = vmatpush3.bf16.msra.mxu1 %v1162_v49  ;;  %1052 = vmatprep.subr.bf16.mxu0 %v1163_v52 }
  0x26   :  { %1074 = vmatprep.subr.bf16.mxu1 %v1164_v53 }
  0x28   :  { %1053 = vmatpush3.bf16.msra.mxu0 %v1165_v54 }
  0x29   :  { %1075 = vmatpush3.bf16.msra.mxu1 %v1166_v55  ;;  %1054 = vmatprep.subr.bf16.mxu0 %v1167_v56 }
  0x2a   :  { %1076 = vmatprep.subr.bf16.mxu1 %v1168_v57 }
  0x2c   :  { %1055 = vmatpush3.bf16.msra.mxu0 %v1169_v58 }
  0x2d   :  { %1077 = vmatpush3.bf16.msra.mxu1 %v1170_v59  ;;  %1056 = vmatprep.subr.bf16.mxu0 %v1171_v60 }
  0x2e   :  { %1078 = vmatprep.subr.bf16.mxu1 %v1172_v61 }
  0x30   :  { %1057 = vmatpush3.bf16.msra.mxu0 %v1173_v62 }
  0x31   :  { %1079 = vmatpush3.bf16.msra.mxu1 %v1174_v63  ;;  %1058 = vmatprep.subr.bf16.mxu0 %v1175_v0 }
  0x32   :  { %1080 = vmatprep.subr.bf16.mxu1 %v1176_v1 }
  0x34   :  { %1059 = vmatpush3.bf16.msra.mxu0 %v1177_v2 }
  0x35   :  { %1081 = vmatpush3.bf16.msra.mxu1 %v1178_v3  ;;  %1060 = vmatprep.subr.bf16.mxu0 %v1179_v4 }
  0x36   :  { %1082 = vmatprep.subr.bf16.mxu1 %v1180_v5 }
  0x38   :  { %1061 = vmatpush3.bf16.msra.mxu0 %v1181_v6 }
  0x39   :  { %1083 = vmatpush3.bf16.msra.mxu1 %v1182_v7  ;;  %1062 = vmatprep.subr.bf16.mxu0 %v1183_v8 }
  0x3a   :  { %1084 = vmatprep.subr.bf16.mxu1 %v1184_v9 }
  0x3b   :  { %12 = vsyncpa [#allocation3], 0  ;;  %v79_v19 = vpack.c.bf16 %v64_v17, %v64_v17  ;;  %v65_v20 = vcombine.high %v63_v18, %v63_v18  ;;  %v1189_v21 = vld [vmem:[%s1510_s1 + $0x138] sm:$0xff]   ;;  %v78_v24 = vpack.c.bf16 %v56_v13, %v56_v13  ;;  %v80_v25 = vpack.c.bf16 %v63_v18, %v63_v18  ;;  %v1192_v26 = vld [vmem:[%s1512_s3] sm:$0xff]  }
  0x3c   :  { %1063 = vmatpush3.bf16.msra.mxu0 %v1185_v11  ;;  %v1190_v22 = vld [vmem:[%s1510_s1 + $0x1b8] sm:$0xff]   ;;  %v1223_v27 = vmov 0.0   ;;  %v1193_v28 = vld [vmem:[%s1512_s3 + $0x8] sm:$0xff]   ;;  %v1194_v29 = vld [vmem:[%s1512_s3 + $0x10] sm:$0xff]   ;;  %vm1224_vm0 = vmmov 0   ;;  %vm802_vm1 = vcmask 523264  }
  0x3d   :  { %1085 = vmatpush3.bf16.msra.mxu1 %v1186_v12  ;;  %v81_v23 = vpack.c.bf16 %v65_v20, %v65_v20  ;;  %1064 = vmatprep.subr.bf16.mxu0 %v1187_v15  ;;  %v1195_v30 = vld [vmem:[%s1512_s3 + $0x18] sm:$0xff]   ;;  %v1196_v31 = vld [vmem:[%s1514_s5] sm:$0xff]   ;;  %v1197_v59 = vld [vmem:[%s1514_s5 + $0x8] sm:$0xff]   ;;  %vm871_vm2 = vcmask 261120   ;;  %s1225_s5 = smov [#allocation2]  }
  0x3e   :  { %1086 = vmatprep.subr.bf16.mxu1 %v1188_v16  ;;  %713 = vmatprep.mubr.bf16.mxu0 %v79_v19  ;;  %v931_v34 = vld [vmem:[%s1511_s2] ss:$0 sm:$0xff]  ;;  %s923_s9 = sshll.u32 %s1225_s5, 4  ;;  %s924_s9 = int_to_ptr.vmem [resolvable:$true] %s923_s9 }
  0x3f   :  { %753 = vmatprep.mubr.bf16.mxu1 %v81_v23  ;;  %v996_v60 = vld [vmem:[%s1513_s4] ss:$0 sm:$0xff]  ;;  %s1198_s4 = scalar_lea.vmem %s924_s9, 16  ;;  %s1202_s10 = scalar_lea.vmem %s924_s9, 32 }
  0x40   :  { %1065 = vmatpush3.bf16.msra.mxu0 %v1189_v21  ;;  %v1002_v4 = vld [vmem:[%s1515_s6] ss:$0 sm:$0xff]  ;;  %p1199_p0 = scmp.ne.s32.totalorder %s924_s9, %s1198_s4  ;;  %p1203_p1 = scmp.lt.s32.totalorder %s924_s9, %s924_s9 }
  0x41   :  { %1087 = vmatpush3.bf16.msra.mxu1 %v1190_v22  ;;  %1102 = vmatprep.subr.bf16.mxu0 %v1223_v27  ;;  %p1204_p2 = scmp.lt.s32.totalorder %s1202_s10, %s1198_s4 }
  0x42   :  { %1114 = vmatprep.subr.bf16.mxu1 %v1223_v27 }
  0x43   :  { %714 = vmatmul.mubr.bf16.vlgmr.msra.gmra.mrb[4].mxu0 %v78_v24  ;;  %p1205_p3 = por %p1204_p2, %p1203_p1 }
  0x44   :  { %754 = vmatmul.mubr.bf16.vlgmr.msra.gmra.mrb[4].mxu1 %v80_v25  ;;  %1103 = vmatpush3.bf16.msra.mxu0 %v1192_v26 }
  0x45   :  { %1104 = vmatprep.subr.bf16.mxu0 %v1223_v27  ;;  %1110 = vmatprep.mubr.msk.bf16.mxu0 %vm1224_vm0, %v1223_v27  ;;  %p1206_p4 = pnand %p1205_p3, %p1199_p0 }
  0x46   :  { %1118 = vmatprep.mubr.msk.bf16.mxu1 %vm1224_vm0, %v1223_v27  ;;  %1115 = vmatpush3.bf16.msra.mxu1 %v1196_v31 }
  0x47   :  { %1116 = vmatprep.subr.bf16.mxu1 %v1223_v27 }
  0x48   :  { %1105 = vmatpush3.bf16.msra.mxu0 %v1193_v28 }
  0x49   :  { %1106 = vmatprep.subr.bf16.mxu0 %v1223_v27 }
  0x4a   :  { %1117 = vmatpush3.bf16.msra.mxu1 %v1197_v59 }
  0x4c   :  { %1107 = vmatpush3.bf16.msra.mxu0 %v1194_v29 }
  0x4d   :  { %1108 = vmatprep.subr.bf16.mxu0 %v1223_v27 }
  0x50   :  { %1109 = vmatpush3.bf16.msra.mxu0 %v1195_v30 }
  0xf6   :  { %v1022_v32 = vpop.f32.mrb[0].mxu0 }
  0xf7   :  { %v1044_v33 = vpop.f32.mrb[0].mxu1  ;;  %v1023_v35 = vpop.f32.mrb[1].mxu0 }
  0xf8   :  { %v1045_v36 = vpop.f32.mrb[1].mxu1  ;;  %v1024_v37 = vadd.f32 %v1023_v35, %v1022_v32  ;;  %v1025_v39 = vpop.f32.mrb[2].mxu0 }
  0xf9   :  { %v1046_v38 = vadd.f32 %v1045_v36, %v1044_v33  ;;  %v1047_v40 = vpop.f32.mrb[2].mxu1  ;;  %v1026_v41 = vpop.f32.mrb[3].mxu0 }
  0xfa   :  { %v1048_v42 = vpop.f32.mrb[3].mxu1  ;;  %v636_v43 = vadd.f32 %v1024_v37, %v931_v34 }
  0xfc   :  { %v676_v44 = vadd.f32 %v1046_v38, %v636_v43 }
 0x116   :  { %v1066_v45 = vpop.f32.mrb[4].mxu0 }
 0x117   :  { %v1088_v46 = vpop.f32.mrb[4].mxu1  ;;  %v1067_v47 = vpop.f32.mrb[5].mxu0 }
 0x118   :  { %v1089_v48 = vpop.f32.mrb[5].mxu1  ;;  %v1068_v49 = vadd.f32 %v1067_v47, %v1066_v45  ;;  %v1069_v51 = vpop.f32.mrb[6].mxu0 }
 0x119   :  { %v1090_v50 = vadd.f32 %v1089_v48, %v1088_v46  ;;  %v1091_v52 = vpop.f32.mrb[6].mxu1  ;;  %v1070_v53 = vpop.f32.mrb[7].mxu0 }
 0x11a   :  { %v1092_v54 = vpop.f32.mrb[7].mxu1  ;;  %v716_v55 = vadd.f32 %v1068_v49, %v676_v44 }
 0x11c   :  { %v756_v56 = vadd.f32 %v1090_v50, %v716_v55 }
 0x11e   :  { %v761_v57 = vmax.f32 %v756_v56, 0.0 }
 0x120   :  { %v762_v58 = vpack.c.bf16 %v761_v57, %v761_v57 }
 0x122   :  { %1111 = vmatmul.mubr.msk.bf16.vlgmr.msra.gmra.mrb[8].mxu0 %vm802_vm1, %v762_v58 }
 0x1f5   :  { %v840_v61 = vpop.f32.mrb[8].mxu0 }
 0x1f6   :  { %v841_v62 = vadd.f32 %v996_v60, %v840_v61  ;;  %v1112_v63 = vpop.f32.mrb[9].mxu0 }
 0x1f7   :  { %v843_v0 = vpop.f32.mrb[10].mxu0 }
 0x1f8   :  { %v846_v1 = vmax.f32 %v841_v62, 0.0  ;;  %v1113_v2 = vpop.f32.mrb[11].mxu0 }
 0x1fa   :  { %v847_v3 = vpack.c.bf16 %v846_v1, %v846_v1 }
 0x1fc   :  { %1119 = vmatmul.mubr.msk.bf16.vlgmr.msra.gmra.mrb[8].mxu1 %vm871_vm2, %v847_v3 }
 0x2cf   :  { %v909_v5 = vpop.f32.mrb[8].mxu1 }
 0x2d0   :  { %v910_v6 = vadd.f32 %v1002_v4, %v909_v5  ;;  %v1120_v7 = vpop.f32.mrb[9].mxu1 }
 0x2d1   :  { %v912_v8 = vpop.f32.mrb[10].mxu1 }
 0x2d2   :  { %v915_v9 = vpack.c.bf16 %v910_v6, %v910_v6  ;;  %v1121_v10 = vpop.f32.mrb[11].mxu1 }
 0x2d4   :  { %916 = vst [vmem:[#allocation2] sm:$0x1] %v915_v9 }
 0x2d5   :  { %1209 = shalt.err (!%p1206_p4)
}
 0x2d6   :  { %s1210_s12 = scalar_lea.hbm %s1516_s7, 16 }
 0x2d7   :  { %p1211_p5 = scmp.ne.s32.totalorder %s1516_s7, %s1210_s12  ;;  %p1214_p6 = scmp.lt.u32.totalorder %s1210_s12, %s1516_s7 }
 0x2d9   :  { %p1216_p7 = pnand %p1214_p6, %p1211_p5 }
 0x2db   :  { %1219 = shalt.err (!%p1216_p7)
}
 0x2dc   :  { %926 = dma.vmem_to_hbm [thread:$0]  %s924_s9, 16, %s1516_s7, [#allocation3]  }
 0x2dd   :  { %1220 = dma.done.wait [#allocation3], 16  }
 0x2de   :  { %1221 = vsyncadd [#allocation3], 4294967280 }
 0x2df   :  { %930 = vsyncpa [#allocation3], 1 }

</bundles_post_ra>
